<compile_context>
chip_gen: v5e
topology: v5e:2x2
jax: 0.10.0
libtpu: 0.0.40
codegen_flags: <defaults>
</compile_context>

<pallas_src>
import math

import jax
import jax.numpy as jnp
from jax import lax
from jax.experimental import pallas as pl
from jax.experimental.pallas import tpu as pltpu


def _make_kernel(inv_eta2, kl_scale):
    # contract last dim of lhs with last dim of rhs (MXU-native, no in-kernel .T)
    dn_last_last = (((1,), (1,)), ((), ()))
    # standard matmul: lhs dim 1 with rhs dim 0
    dn_matmul = (((1,), (0,)), ((), ()))

    def kernel(x_ref, y_ref, w_ref, ut_ref, g_ref, klc_ref, part_ref, kl_ref):
        x = x_ref[...]            # (TM, d0)   (f32 or bf16)
        y = y_ref[...]            # (TM, d0)
        W = w_ref[...]            # (d1, d0)
        Ut = ut_ref[...]          # (d1, d0)   = U^T
        G = g_ref[...]            # (d1, d1)   = U^T U          (f32)
        klc = klc_ref[...]        # (d1, 1)    = beta*(c^2 s^2/eta^2 - log s^2 - 1)

        # Encoder pre-activation, feature-major: (d1, TM) — the only full-K pass on x.
        wx_t = lax.dot_general(W, x, dn_last_last,
                               preferred_element_type=jnp.float32)
        # U^T @ y^T : (d1, TM) — the only full-K pass on y.
        uy_t = lax.dot_general(Ut, y, dn_last_last,
                               preferred_element_type=jnp.float32)
        # G @ wx_t : (d1, TM)  (tiny d1 x d1 contraction)
        gwx = lax.dot_general(G, wx_t, dn_matmul,
                              preferred_element_type=jnp.float32)

        yf = y.astype(jnp.float32)
        yy = jnp.sum(yf * yf)

        wx2 = wx_t * wx_t
        #  sum_i ||U wx_i - y_i||^2 = sum(gwx*wx_t) - 2 sum(wx_t*uy_t) + sum(y*y)
        part_rec = jnp.sum(gwx * wx_t) - 2.0 * jnp.sum(wx_t * uy_t) + yy
        part = inv_eta2 * part_rec + kl_scale * jnp.sum(wx2)

        # One scalar per grid step, broadcast over the tile's lane-aligned block;
        # the wrapper reads parts[0, ::128].
        part_ref[...] = jnp.full(part_ref.shape, part, dtype=part_ref.dtype)

        # Per-latent-dim KL, feature-major (d1, TM); wrapper transposes back.
        kl_ref[...] = kl_scale * wx2 + klc

    return kernel


def _round_up(v, m):
    return -(-v // m) * m


def linear_vae_forward(x, y, W, U, sigma_el, phi, P_A, *, c, eta_dec, beta,
                       tm=1024, use_bf16=False):
    """Forward pass of LinearVAE. Returns (loss, U, W, V, loss_KL_per_dim).

    tm: batch tile (rows per grid step); coerced to a multiple of 128 when the
        batch is tiled.  With the fused reconstruction, tm=1024 fits on v7x's
        64 MiB VMEM; v6e/v5e (128 MiB) can use tm=2048.
    use_bf16: cast x/y/W/U^T to bf16 at the pallas_call boundary (f32 MXU
        accumulation).  Biggest win on v5e; halves HBM traffic everywhere.
    """
    N, d0 = x.shape
    d1 = W.shape[0]
    eta_enc = eta_dec / c
    c2 = float(c) ** 2
    inv_eta2 = 1.0 / float(eta_dec) ** 2
    kl_scale = float(beta) * c2 * inv_eta2

    f32 = jnp.float32
    in_dtype = jnp.bfloat16 if use_bf16 else f32

    Wf = W.astype(f32)
    Uf = U.astype(f32)
    sigma_el = sigma_el.astype(f32)
    sigma2 = sigma_el * sigma_el

    # ---- batch-independent terms, hoisted out of the kernel (plain XLA) ----
    V = (Wf @ P_A.astype(f32)) * jnp.sqrt(phi.astype(f32))[None, :]
    trace_term = jnp.sum(jnp.sum(Uf * Uf, axis=0) * sigma2)        # trace(U^T U Sigma)
    loss_const = (
        inv_eta2 * trace_term
        + beta * (c2 * jnp.sum(sigma2) * inv_eta2
                  - 2.0 * jnp.sum(jnp.log(sigma_el))
                  + 2.0 * d1 * math.log(eta_enc)
                  - d1)
        + 2.0 * math.log(eta_enc)   # added AFTER the beta multiply, as in the PyTorch code
    )
    kl_const_col = (beta * (c2 * sigma2 * inv_eta2 - jnp.log(sigma2) - 1.0)).reshape(d1, 1)

    Ut = Uf.T                                   # (d1, d0), resident in VMEM
    G = Ut @ Ut.T                               # U^T U, (d1, d1), f32

    x_in = x.astype(in_dtype)
    y_in = y.astype(in_dtype)
    W_in = Wf.astype(in_dtype)
    Ut_in = Ut.astype(in_dtype)

    # ---- batch tiling: TM multiple of 128, or a single full (padded-to-8) tile ----
    if N <= tm:
        tm_eff = max(8, _round_up(N, 8))
    else:
        tm_eff = max(128, (tm // 128) * 128)
    n_pad = _round_up(N, tm_eff)
    if n_pad != N:
        x_in = jnp.pad(x_in, ((0, n_pad - N), (0, 0)))
        y_in = jnp.pad(y_in, ((0, n_pad - N), (0, 0)))
    num_tiles = n_pad // tm_eff

    # ---- scoped-VMEM limit: lane-padded estimate, capped below physical VMEM ----
    in_bytes = 2 if use_bf16 else 4
    d0_l = _round_up(d0, 128)
    tm_l = _round_up(tm_eff, 128)
    tm_s = _round_up(tm_eff, 8)
    d1_s = _round_up(d1, 8)
    vmem_est = (
        2 * 2 * tm_s * d0_l * in_bytes          # x, y double-buffered tiles
        + 2 * d1_s * tm_l * 4                   # kl out blocks (double-buffered)
        + 2 * 8 * 128 * 4                       # partial-loss out blocks
        + 2 * d1_s * d0_l * in_bytes            # W, U^T resident
        + d1_s * 128 * 4 + d1_s * 128 * 4       # G, kl const resident
        + 4 * d1_s * tm_l * 4                   # wx_t / uy_t / gwx / wx2 live
        + 2 * tm_s * d0_l * 4                   # headroom for f32 copies of x/y values
    )
    try:
        phys_vmem = int(pltpu.get_tpu_info().vmem_capacity_bytes)
        if phys_vmem <= 0:
            phys_vmem = 64 * 1024 * 1024
    except Exception:
        phys_vmem = 64 * 1024 * 1024            # v7x worst case — safe everywhere
    cap = phys_vmem - 8 * 1024 * 1024           # leave room for Mosaic internal scratch
    vmem_limit = int(min(max(int(1.5 * vmem_est) + 4 * 1024 * 1024,
                             32 * 1024 * 1024), cap))

    kernel = _make_kernel(inv_eta2, kl_scale)

    parts, kl_t = pl.pallas_call(
        kernel,
        out_shape=(
            jax.ShapeDtypeStruct((8, num_tiles * 128), f32),   # per-tile partial losses
            jax.ShapeDtypeStruct((d1, n_pad), f32),            # feature-major per-dim KL
        ),
        grid=(num_tiles,),
        in_specs=[
            pl.BlockSpec((tm_eff, d0), lambda i: (i, 0)),      # x tile
            pl.BlockSpec((tm_eff, d0), lambda i: (i, 0)),      # y tile
            pl.BlockSpec((d1, d0), lambda i: (0, 0)),          # W (resident)
            pl.BlockSpec((d1, d0), lambda i: (0, 0)),          # U^T (resident)
            pl.BlockSpec((d1, d1), lambda i: (0, 0)),          # G = U^T U (resident)
            pl.BlockSpec((d1, 1), lambda i: (0, 0)),           # KL const column (resident)
        ],
        out_specs=(
            pl.BlockSpec((8, 128), lambda i: (0, i)),
            pl.BlockSpec((d1, tm_eff), lambda i: (0, i)),
        ),
        compiler_params=pltpu.CompilerParams(
            dimension_semantics=("parallel",),
            vmem_limit_bytes=vmem_limit,
        ),
    )(x_in, y_in, W_in, Ut_in, G, kl_const_col)

    loss = jnp.sum(parts[0, ::128]) / N + loss_const
    kl_per_dim = kl_t[:, :N].T                                 # back to (N, d1)
    # Same tuple as the PyTorch module: (loss, U, W, V, loss_KL_per_dim)
    return loss, Uf, Wf, V, kl_per_dim


def linear_vae_reference(x, y, W, U, sigma_el, phi, P_A, *, c, eta_dec, beta):
    """Pure-JAX reference mirroring the PyTorch forward line-by-line."""
    d1 = W.shape[0]
    eta_enc = eta_dec / c
    sigma2 = sigma_el ** 2
    Phi_sqrt = jnp.diag(jnp.sqrt(phi))
    V = W @ P_A @ Phi_sqrt
    wx = (W @ x.T).T
    recon = (U @ W @ x.T).T
    loss_rec = jnp.mean(jnp.sum((recon - y) ** 2, axis=1))
    loss_rec = loss_rec + jnp.trace(U.T @ U @ jnp.diag(sigma2))
    loss_rec = loss_rec / eta_dec ** 2
    loss_kl = c ** 2 * jnp.mean(jnp.sum(wx ** 2, axis=1)) / eta_dec ** 2
    loss_kl = loss_kl + c ** 2 * jnp.sum(sigma2) / eta_dec ** 2
    loss_kl = loss_kl - 2.0 * jnp.sum(jnp.log(sigma_el))
    loss_kl = loss_kl + 2.0 * d1 * math.log(eta_enc)
    loss_kl = loss_kl - d1
    loss_kl = loss_kl * beta
    kl_pd = c ** 2 * wx ** 2 / eta_dec ** 2
    kl_pd = kl_pd + c ** 2 * sigma2 / eta_dec ** 2
    kl_pd = kl_pd - jnp.log(sigma2)
    loss_kl = loss_kl + 2.0 * math.log(eta_enc)   # replicated post-beta add from PyTorch
    kl_pd = kl_pd - 1.0
    kl_pd = kl_pd * beta
    return loss_rec + loss_kl, U, W, V, kl_pd


if __name__ == "__main__":
    # Small test shapes (d_1 = 5 is fixed by Sigma_elements = [8,4,2,1,0.5]).
    # N=250 with tm=128 exercises a 2-tile grid plus exact zero-padding (250 -> 256).
    N, d0, d1 = 250, 16, 5
    c, eta_dec, beta = 2.0, 1.0, 0.5

    key = jax.random.PRNGKey(0)
    k1, k2, k3, k4, k5, k6 = jax.random.split(key, 6)
    x = jax.random.normal(k1, (N, d0), dtype=jnp.float32)
    y = jax.random.normal(k2, (N, d0), dtype=jnp.float32)
    W = 0.1 * jax.random.normal(k3, (d1, d0), dtype=jnp.float32)   # torch.normal(0, 0.1)
    U = 0.1 * jax.random.normal(k4, (d0, d1), dtype=jnp.float32)   # torch.normal(0, 0.1)
    sigma_el = jnp.array([8.0, 4.0, 2.0, 1.0, 0.5], dtype=jnp.float32)
    phi = jax.random.uniform(k5, (d0,), dtype=jnp.float32, minval=0.1, maxval=1.0)
    P_A = jax.random.normal(k6, (d0, d0), dtype=jnp.float32)
    # TODO(synk): dataset.Z is loaded in __init__ but unused in forward; omitted.

    outs = linear_vae_forward(x, y, W, U, sigma_el, phi, P_A,
                              c=c, eta_dec=eta_dec, beta=beta, tm=128)
    outs = jax.block_until_ready(outs)

    refs = linear_vae_reference(x, y, W, U, sigma_el, phi, P_A,
                                c=c, eta_dec=eta_dec, beta=beta)
    loss_k, _, _, V_k, kl_k = outs
    loss_r, _, _, V_r, kl_r = refs
    assert kl_k.shape == (N, d1), kl_k.shape
    assert jnp.allclose(loss_k, loss_r, rtol=1e-4, atol=1e-4), (loss_k, loss_r)
    assert jnp.allclose(V_k, V_r, rtol=1e-4, atol=1e-5)
    assert jnp.allclose(kl_k, kl_r, rtol=1e-4, atol=1e-5)

    print("KERNEL_OK")
</pallas_src>

<mosaic_0001>
module attributes {stable_mosaic.version = 11 : i64} {
  func.func @kernel(%arg0: i32, %arg1: memref<128x16xf32, #tpu.memory_space<vmem>>, %arg2: memref<128x16xf32, #tpu.memory_space<vmem>>, %arg3: memref<5x16xf32, #tpu.memory_space<vmem>>, %arg4: memref<5x16xf32, #tpu.memory_space<vmem>>, %arg5: memref<5x5xf32, #tpu.memory_space<vmem>>, %arg6: memref<5x1xf32, #tpu.memory_space<vmem>>, %arg7: memref<8x128xf32, #tpu.memory_space<vmem>>, %arg8: memref<5x128xf32, #tpu.memory_space<vmem>>) attributes {dimension_semantics = [#tpu.dimension_semantics<parallel>], iteration_bounds = array<i64: 2>, scalar_prefetch = 0 : i64, scratch_operands = 0 : i64, tpu.core_type = #tpu.core_type<tc>, window_params = [{transform_indices = @transform_0, window_bounds = array<i64: 128, 16>}, {transform_indices = @transform_1, window_bounds = array<i64: 128, 16>}, {pipeline_mode = #tpu.pipeline_mode<synchronous>, transform_indices = @transform_2, window_bounds = array<i64: 5, 16>}, {pipeline_mode = #tpu.pipeline_mode<synchronous>, transform_indices = @transform_3, window_bounds = array<i64: 5, 16>}, {pipeline_mode = #tpu.pipeline_mode<synchronous>, transform_indices = @transform_4, window_bounds = array<i64: 5, 5>}, {pipeline_mode = #tpu.pipeline_mode<synchronous>, transform_indices = @transform_5, window_bounds = array<i64: 5, 1>}, {transform_indices = @transform_6, window_bounds = array<i64: 8, 128>}, {transform_indices = @transform_7, window_bounds = array<i64: 5, 128>}]} {
    %c0 = arith.constant 0 : index
    %c0_0 = arith.constant 0 : index
    %0 = vector.load %arg1[%c0, %c0_0] : memref<128x16xf32, #tpu.memory_space<vmem>>, vector<128x16xf32>
    %c0_1 = arith.constant 0 : index
    %c0_2 = arith.constant 0 : index
    %1 = vector.load %arg2[%c0_1, %c0_2] : memref<128x16xf32, #tpu.memory_space<vmem>>, vector<128x16xf32>
    %c0_3 = arith.constant 0 : index
    %c0_4 = arith.constant 0 : index
    %2 = vector.load %arg3[%c0_3, %c0_4] : memref<5x16xf32, #tpu.memory_space<vmem>>, vector<5x16xf32>
    %c0_5 = arith.constant 0 : index
    %c0_6 = arith.constant 0 : index
    %3 = vector.load %arg4[%c0_5, %c0_6] : memref<5x16xf32, #tpu.memory_space<vmem>>, vector<5x16xf32>
    %c0_7 = arith.constant 0 : index
    %c0_8 = arith.constant 0 : index
    %4 = vector.load %arg5[%c0_7, %c0_8] : memref<5x5xf32, #tpu.memory_space<vmem>>, vector<5x5xf32>
    %c0_9 = arith.constant 0 : index
    %c0_10 = arith.constant 0 : index
    %5 = vector.load %arg6[%c0_9, %c0_10] : memref<5x1xf32, #tpu.memory_space<vmem>>, vector<5x1xf32>
    %cst = arith.constant dense<0.000000e+00> : vector<5x128xf32>
    %6 = tpu.matmul %2, %0, %cst {dimension_numbers = #tpu.dot_dimension_numbers<[1], [1], [0], [0], [0, 0, 1, 0], [], []>} : vector<5x16xf32>, vector<128x16xf32>, vector<5x128xf32> -> vector<5x128xf32>
    %cst_11 = arith.constant dense<0.000000e+00> : vector<5x128xf32>
    %7 = tpu.matmul %3, %1, %cst_11 {dimension_numbers = #tpu.dot_dimension_numbers<[1], [1], [0], [0], [0, 0, 1, 0], [], []>} : vector<5x16xf32>, vector<128x16xf32>, vector<5x128xf32> -> vector<5x128xf32>
    %cst_12 = arith.constant dense<0.000000e+00> : vector<5x128xf32>
    %8 = tpu.matmul %4, %6, %cst_12 {dimension_numbers = #tpu.dot_dimension_numbers<[1], [0], [0], [1], [0, 0, 1, 1], [], []>} : vector<5x5xf32>, vector<5x128xf32>, vector<5x128xf32> -> vector<5x128xf32>
    %9 = arith.mulf %1, %1 : vector<128x16xf32>
    %10 = vector.shape_cast %9 : vector<128x16xf32> to vector<1x128x16xf32>
    %cst_13 = arith.constant dense<0.000000e+00> : vector<1xf32>
    %11 = vector.multi_reduction <add>, %10, %cst_13 [1, 2] : vector<1x128x16xf32> to vector<1xf32>
    %12 = vector.shape_cast %11 : vector<1xf32> to vector<1x1x1xf32>
    %13 = vector.extract %12[0, 0, 0] : f32 from vector<1x1x1xf32>
    %14 = arith.mulf %6, %6 : vector<5x128xf32>
    %15 = arith.mulf %8, %6 : vector<5x128xf32>
    %16 = vector.shape_cast %15 : vector<5x128xf32> to vector<1x5x128xf32>
    %cst_14 = arith.constant dense<0.000000e+00> : vector<1xf32>
    %17 = vector.multi_reduction <add>, %16, %cst_14 [1, 2] : vector<1x5x128xf32> to vector<1xf32>
    %18 = vector.shape_cast %17 : vector<1xf32> to vector<1x1x1xf32>
    %19 = vector.extract %18[0, 0, 0] : f32 from vector<1x1x1xf32>
    %20 = arith.mulf %6, %7 : vector<5x128xf32>
    %21 = vector.shape_cast %20 : vector<5x128xf32> to vector<1x5x128xf32>
    %cst_15 = arith.constant dense<0.000000e+00> : vector<1xf32>
    %22 = vector.multi_reduction <add>, %21, %cst_15 [1, 2] : vector<1x5x128xf32> to vector<1xf32>
    %23 = vector.shape_cast %22 : vector<1xf32> to vector<1x1x1xf32>
    %24 = vector.extract %23[0, 0, 0] : f32 from vector<1x1x1xf32>
    %cst_16 = arith.constant 2.000000e+00 : f32
    %25 = arith.mulf %cst_16, %24 : f32
    %26 = arith.subf %19, %25 : f32
    %27 = arith.addf %26, %13 : f32
    %cst_17 = arith.constant 1.000000e+00 : f32
    %28 = arith.mulf %cst_17, %27 : f32
    %29 = vector.shape_cast %14 : vector<5x128xf32> to vector<1x5x128xf32>
    %cst_18 = arith.constant dense<0.000000e+00> : vector<1xf32>
    %30 = vector.multi_reduction <add>, %29, %cst_18 [1, 2] : vector<1x5x128xf32> to vector<1xf32>
    %31 = vector.shape_cast %30 : vector<1xf32> to vector<1x1x1xf32>
    %32 = vector.extract %31[0, 0, 0] : f32 from vector<1x1x1xf32>
    %cst_19 = arith.constant 2.000000e+00 : f32
    %33 = arith.mulf %cst_19, %32 : f32
    %34 = arith.addf %28, %33 : f32
    %35 = vector.broadcast %34 : f32 to vector<8x128xf32>
    %c0_20 = arith.constant 0 : index
    %c0_21 = arith.constant 0 : index
    %36 = vector.load %arg7[%c0_20, %c0_21] : memref<8x128xf32, #tpu.memory_space<vmem>>, vector<8x128xf32>
    tpu.vector_store %arg7[%c0_20, %c0_21], %35 {strides = array<i32>} : memref<8x128xf32, #tpu.memory_space<vmem>>, vector<8x128xf32>,
    %cst_22 = arith.constant 2.000000e+00 : f32
    %37 = vector.broadcast %cst_22 : f32 to vector<5x128xf32>
    %38 = arith.mulf %37, %14 : vector<5x128xf32>
    %39 = vector.broadcast %5 : vector<5x1xf32> to vector<5x128xf32>
    %40 = arith.addf %38, %39 : vector<5x128xf32>
    %c0_23 = arith.constant 0 : index
    %c0_24 = arith.constant 0 : index
    %41 = vector.load %arg8[%c0_23, %c0_24] : memref<5x128xf32, #tpu.memory_space<vmem>>, vector<5x128xf32>
    tpu.vector_store %arg8[%c0_23, %c0_24], %40 {strides = array<i32>} : memref<5x128xf32, #tpu.memory_space<vmem>>, vector<5x128xf32>,
    return
  }
  func.func @transform_0(%arg0: i32) -> (i32, i32) {
    %c0_i32 = arith.constant 0 : i32
    %c0_i32_0 = arith.constant 0 : i32
    return %arg0, %c0_i32 : i32, i32
  }
  func.func @transform_1(%arg0: i32) -> (i32, i32) {
    %c0_i32 = arith.constant 0 : i32
    %c0_i32_0 = arith.constant 0 : i32
    return %arg0, %c0_i32 : i32, i32
  }
  func.func @transform_2(%arg0: i32) -> (i32, i32) {
    %c0_i32 = arith.constant 0 : i32
    %c0_i32_0 = arith.constant 0 : i32
    %c0_i32_1 = arith.constant 0 : i32
    return %c0_i32, %c0_i32_0 : i32, i32
  }
  func.func @transform_3(%arg0: i32) -> (i32, i32) {
    %c0_i32 = arith.constant 0 : i32
    %c0_i32_0 = arith.constant 0 : i32
    %c0_i32_1 = arith.constant 0 : i32
    return %c0_i32, %c0_i32_0 : i32, i32
  }
  func.func @transform_4(%arg0: i32) -> (i32, i32) {
    %c0_i32 = arith.constant 0 : i32
    %c0_i32_0 = arith.constant 0 : i32
    %c0_i32_1 = arith.constant 0 : i32
    return %c0_i32, %c0_i32_0 : i32, i32
  }
  func.func @transform_5(%arg0: i32) -> (i32, i32) {
    %c0_i32 = arith.constant 0 : i32
    %c0_i32_0 = arith.constant 0 : i32
    %c0_i32_1 = arith.constant 0 : i32
    return %c0_i32, %c0_i32_0 : i32, i32
  }
  func.func @transform_6(%arg0: i32) -> (i32, i32) {
    %c0_i32 = arith.constant 0 : i32
    %c0_i32_0 = arith.constant 0 : i32
    return %c0_i32, %arg0 : i32, i32
  }
  func.func @transform_7(%arg0: i32) -> (i32, i32) {
    %c0_i32 = arith.constant 0 : i32
    %c0_i32_0 = arith.constant 0 : i32
    return %c0_i32, %arg0 : i32, i32
  }
}

</mosaic_0001>

<bundles_post_ra>
// kernel: tpu_custom_call.1
= control target key start
LH: loop header
LB: loop body
LE: loop exit
PB: predicated region body
PF: predicated region fallthrough
CT: control target
= control target key end

     0   :  { %s1270_s0 = inlined_call_operand.vmem [shape: f32[256,16], index: 0, kind: input, shape index: {}]   ;;  %s1271_s1 = inlined_call_operand.vmem [shape: f32[256,16], index: 1, kind: input, shape index: {}]   ;;  %s1272_s2 = inlined_call_operand.vmem [shape: f32[5,16], index: 2, kind: input, shape index: {}]   ;;  %s1273_s3 = inlined_call_operand.vmem [shape: f32[5,16], index: 3, kind: input, shape index: {}]   ;;  %s1274_s4 = inlined_call_operand.vmem [shape: f32[5,5], index: 4, kind: input, shape index: {}]   ;;  %s1275_s5 = inlined_call_operand.vmem [shape: f32[5,1], index: 5, kind: input, shape index: {}]   ;;  %s1276_s6 = inlined_call_operand.hbm [shape: f32[8,256], index: 6, kind: output, shape index: {0}]   ;;  %s1277_s7 = inlined_call_operand.hbm [shape: f32[5,256], index: 7, kind: output, shape index: {1}]  }
   0x1   :  { %1279 = sst [smem:[#allocation8_spill]] %s1270_s0 }
   0x2   :  { %1280 = sst [smem:[#allocation9_spill]] %s1271_s1 }
   0x3   :  { %1281 = sst [smem:[#allocation10_spill]] %s1272_s2 }
   0x4   :  { %1282 = sst [smem:[#allocation11_spill]] %s1273_s3 }
   0x5   :  { %1283 = sst [smem:[#allocation12_spill]] %s1274_s4 }
   0x6   :  { %13 = vsyncpa [#allocation3], 0 }
   0x7   :  { %15 = vsyncpa [#allocation3 + $0x1], 0 }
   0x8   :  { %16 = vsyncpa [#allocation5], 0 }
   0x9   :  { %18 = vsyncpa [#allocation5 + $0x1], 0  ;;  %s1006_s24 = smov 0   ;;  %s1008_s25 = smov 0  }
   0xa   :  { %s1010_s26 = smov 0   ;;  %s1012_s27 = smov 0  }
   0xb LB: > { %s1027_s28 = sadd.s32 4294967295, %s963_s27   ;;  %s762_s29 = sadd.s32 4294967294, %s963_s27   ;;  %s963_s27 = sphi %s1012_s27, %s1295_s27   ;;  %s959_s26 = sphi %s1010_s26, %s1294_s26   ;;  %s955_s25 = sphi %s1008_s25, %s1293_s25   ;;  %s951_s24 = sphi %s1006_s24, %s1292_s24  }
   0xc   : > { %s1031_s30 = sadd.s32 1, %s963_s27   ;;  %s167_s8 = sadd.s32 1, %s959_s26 }
   0xd   : > { %s164_s9 = ssub.s32 %s963_s27, %s1031_s30  ;;  %p177_p0 = scmp.ne.s32.totalorder %s959_s26, %s955_s25 }
   0xe   : > { %p165_p1 = scmp.eq.s32.totalorder %s164_s9, 0  ;;  %p178_p2 = scmp.eq.s32.totalorder %s1027_s28, 1 }
   0xf   : > { %p183_p3 = scmp.ne.s32.totalorder %s955_s25, %s951_s24  ;;  %p184_p4 = scmp.eq.s32.totalorder %s762_s29, 1 }
  0x10   : > { %s1042_s10 = scalar_select %p165_p1, %s959_s26, %s167_s8  }
  0x11   : > { %p1044_p5 = por %p178_p2, %p177_p0  ;;  %p1048_p6 = por %p184_p4, %p183_p3 }
  0x12   : > { %p765_p7 = scmp.ge.s32.totalorder %s963_s27, 1  ;;  %p258_p8 = scmp.lt.s32.totalorder %s963_s27, 3 }
  0x14   : > { %p259_p9 = pnand %p765_p7, %p258_p8 }
  0x15   : > { %s768_s13 = sshll.u32 (!%p259_p9), %s1027_s28, 4  ;;  %s1286_s0 = sld [smem:[#allocation8_spill]] (!%p259_p9) }
  0x16   : > { %262 = sbr.rel (%p259_p9) target bundleno = 547 (0x223), region = 44  ;;  %p301_p10 = scmp.lt.s32.totalorder (!%p259_p9), %s768_s13, 31 }
  0x17   : > { %s1287_s1 = sld [smem:[#allocation9_spill]] (!%p259_p9)  ;;  %s810_s18 = sshll.u32 (!%p259_p9), %s1027_s28, 3 }
  0x18   : > { %s1288_s2 = sld [smem:[#allocation10_spill]] (!%p259_p9)  ;;  %s653_s21 = scalar_lea.hbm (!%p259_p9), %s1277_s7, %s810_s18 }
  0x19   : > { %s1289_s3 = sld [smem:[#allocation11_spill]] (!%p259_p9)  ;;  %s657_s23 = sshll.u32 (!%p259_p9), %s653_s21, 4  ;;  %s658_s23 = int_to_ptr.hbm [resolvable:$true] %s657_s23 }
  0x1a   : > { %s1290_s4 = sld [smem:[#allocation12_spill]] (!%p259_p9)  ;;  %s883_s8 = sshra.s32 (!%p259_p9), %s658_s23, 4  ;;  %s884_s8 = int_to_ptr.hbm [resolvable:$true] %s883_s8 }
  0x1b   : > { %s1297_s13 = smov (!%p301_p10, %s768_s13), 31  ;;  %vm348_vm0 = vcmask 130048   ;;  %v347_v33 = vld [vmem:[%s1275_s5] sm:$0x1f]  ;;  %v965_v39 = vmov 0   ;;  %vm495_vm1 = vcmask 1044480   ;;  %p890_p0 = scmp.lt.s32.totalorder %s884_s8, %s1277_s7 }
  0x1c   : > { %s769_s14 = sshll.u32 %s1297_s13, 3  ;;  %867 = vset.pattern.permute.xlu2 %v965_v39  ;;  %868 = vset.pattern.permute.xlu0 %v965_v39  ;;  %s1175_s13 = sand.u32 1, %s955_s25   ;;  %vm491_vm2 = vcmask 39936  }
  0x1d   : > { %s1058_s17 = scalar_lea.vmem %s1286_s0, %s769_s14  ;;  %s1063_s20 = scalar_lea.vmem %s1287_s1, %s769_s14  ;;  %618 = vperm.xlu2 %867, %v347_v33  }
  0x1e   : > { %v327_v0 = vld [vmem:[%s1058_s17 + $0x78] sm:$0xff]  ;;  %v326_v2 = vld [vmem:[%s1058_s17 + $0x70] sm:$0xff]  ;;  %v325_v4 = vld [vmem:[%s1058_s17 + $0x68] sm:$0xff]  ;;  %s1278_s16 = sshll.u32 %s1175_s13, 3  ;;  %s629_s29 = scalar_lea.sflag [#allocation5], %s1175_s13 }
  0x1f   : > { %v1067_v1 = vld [vmem:[%s1063_s20 + $0x78] sm:$0xff]  ;;  %772 = vmatpush.xpose.msk.msra.mxu0 %vm348_vm0, %v327_v0  ;;  %v1074_v3 = vld [vmem:[%s1063_s20 + $0x70] sm:$0xff]  ;;  %v1081_v5 = vld [vmem:[%s1063_s20 + $0x68] sm:$0xff]  ;;  %s885_s9 = scalar_lea.hbm %s884_s8, 8 }
  0x20   : > { %789 = vmatpush.xpose.msk.msra.mxu1 %vm348_vm0, %v1067_v1  ;;  %v324_v6 = vld [vmem:[%s1058_s17 + $0x60] sm:$0xff]  ;;  %v323_v8 = vld [vmem:[%s1058_s17 + $0x58] sm:$0xff]  ;;  %v322_v10 = vld [vmem:[%s1058_s17 + $0x50] sm:$0xff]  ;;  %p886_p11 = scmp.ne.s32.totalorder %s884_s8, %s885_s9 }
  0x21   : > { %v1088_v7 = vld [vmem:[%s1063_s20 + $0x60] sm:$0xff]  ;;  %v1095_v9 = vld [vmem:[%s1063_s20 + $0x58] sm:$0xff]  ;;  %v1102_v11 = vld [vmem:[%s1063_s20 + $0x50] sm:$0xff] }
  0x22   : > { %v321_v12 = vld [vmem:[%s1058_s17 + $0x48] sm:$0xff]  ;;  %v320_v16 = vld [vmem:[%s1058_s17 + $0x40] sm:$0xff]  ;;  %v330_v18 = vld [vmem:[%s1063_s20 + $0x10] sm:$0xff]  ;;  %p887_p12 = pnand %p886_p11, %p1044_p5 }
  0x23   : > { %773 = vmatpush.xpose.msk.msra.mxu0 %vm348_vm0, %v326_v2  ;;  %v1109_v13 = vld [vmem:[%s1063_s20 + $0x48] sm:$0xff]  ;;  %v1117_v17 = vld [vmem:[%s1063_s20 + $0x40] sm:$0xff]  ;;  %v521_v19 = vmul.f32 %v330_v18, %v330_v18  ;;  %v331_v20 = vld [vmem:[%s1063_s20 + $0x18] sm:$0xff] }
  0x24   : > { %790 = vmatpush.xpose.msk.msra.mxu1 %vm348_vm0, %v1074_v3  ;;  %v329_v14 = vld [vmem:[%s1063_s20 + $0x8] sm:$0xff]  ;;  %v328_v21 = vld [vmem:[%s1063_s20] sm:$0xff]  ;;  %v522_v22 = vmul.f32 %v331_v20, %v331_v20  ;;  %v319_v25 = vld [vmem:[%s1058_s17 + $0x38] sm:$0xff]  ;;  %p888_p13 = pneg %p887_p12 }
  0x25   : > { %v520_v15 = vmul.f32 %v329_v14, %v329_v14  ;;  %v519_v24 = vmul.f32 %v328_v21, %v328_v21  ;;  %v1128_v26 = vld [vmem:[%s1063_s20 + $0x38] sm:$0xff]  ;;  %v332_v27 = vld [vmem:[%s1063_s20 + $0x20] sm:$0xff]  ;;  %v538_v29 = vsel %vm348_vm0, %v521_v19, 0.0  ;;  %v333_v31 = vld [vmem:[%s1063_s20 + $0x28] sm:$0xff] }
  0x26   : > { %v523_v28 = vmul.f32 %v332_v27, %v332_v27  ;;  %v524_v34 = vmul.f32 %v333_v31, %v333_v31  ;;  %v540_v35 = vsel %vm348_vm0, %v522_v22, 0.0  ;;  %v318_v36 = vld [vmem:[%s1058_s17 + $0x30] sm:$0xff]  ;;  %v317_v44 = vld [vmem:[%s1058_s17 + $0x28] sm:$0xff]  ;;  %v316_v48 = vld [vmem:[%s1058_s17 + $0x20] sm:$0xff] }
  0x27   : > { %774 = vmatpush.xpose.msk.msra.mxu0 %vm348_vm0, %v325_v4  ;;  %v536_v23 = vsel %vm348_vm0, %v520_v15, 0.0  ;;  %v535_v30 = vsel %vm348_vm0, %v519_v24, 0.0  ;;  %v334_v37 = vld [vmem:[%s1063_s20 + $0x30] sm:$0xff]  ;;  %v315_v50 = vld [vmem:[%s1058_s17 + $0x18] sm:$0xff]  ;;  %v313_v52 = vld [vmem:[%s1058_s17 + $0x8] sm:$0xff]  ;;  %v526_v4 = vmul.f32 %v1128_v26, %v1128_v26 }
  0x28   : > { %791 = vmatpush.xpose.msk.msra.mxu1 %vm348_vm0, %v1081_v5  ;;  %v537_v32 = vadd.f32 %v536_v23, %v535_v30  ;;  %v525_v40 = vmul.f32 %v334_v37, %v334_v37  ;;  %v542_v41 = vsel %vm348_vm0, %v523_v28, 0.0  ;;  %v544_v43 = vsel %vm348_vm0, %v524_v34, 0.0  ;;  %v314_v51 = vld [vmem:[%s1058_s17 + $0x10] sm:$0xff]  ;;  %v312_v53 = vld [vmem:[%s1058_s17] sm:$0xff]  ;;  %s1185_s17 = scalar_lea.vmem [#allocation4], %s1278_s16  ;;  %s889_s16 = scalar_lea.hbm %s1277_s7, 16 }
  0x29   : > { %v344_v54 = vld [vmem:[%s1288_s2] sm:$0x1f]  ;;  %s655_s22 = sshll.u32 %s1185_s17, 4  ;;  %p891_p1 = scmp.lt.s32.totalorder %s889_s16, %s885_s9  ;;  %s656_s22 = int_to_ptr.vmem [resolvable:$true] %s655_s22 }
  0x2a   : > { %v539_v38 = vadd.f32 %v538_v29, %v537_v32  ;;  %v546_v46 = vsel %vm348_vm0, %v525_v40, 0.0  ;;  %v345_v55 = vld [vmem:[%s1289_s3] sm:$0x1f] }
  0x2b   : > { %775 = vmatpush.xpose.msk.msra.mxu0 %vm348_vm0, %v324_v6  ;;  %v346_v56 = vld [vmem:[%s1290_s4] sm:$0x1f]  ;;  %v527_v6 = vmul.f32 %v1117_v17, %v1117_v17  ;;  %p892_p2 = por %p891_p1, %p890_p0 }
  0x2c   : > { %792 = vmatpush.xpose.msk.msra.mxu1 %vm348_vm0, %v1088_v7  ;;  %v541_v42 = vadd.f32 %v540_v35, %v539_v38 }
  0x2d   : > { %p893_p3 = pnand %p892_p2, %p888_p13 }
  0x2e   : > { %v543_v45 = vadd.f32 %v542_v41, %v541_v42 }
  0x2f   : > { %776 = vmatpush.xpose.msk.msra.mxu0 %vm348_vm0, %v323_v8  ;;  %v528_v8 = vmul.f32 %v1109_v13, %v1109_v13 }
  0x30   : > { %793 = vmatpush.xpose.msk.msra.mxu1 %vm348_vm0, %v1095_v9  ;;  %v545_v47 = vadd.f32 %v544_v43, %v543_v45 }
  0x32   : > { %v547_v49 = vadd.f32 %v546_v46, %v545_v47 }
  0x33   : > { %777 = vmatpush.xpose.msk.msra.mxu0 %vm348_vm0, %v322_v10  ;;  %v548_v10 = vsel %vm348_vm0, %v526_v4, 0.0 }
  0x34   : > { %794 = vmatpush.xpose.msk.msra.mxu1 %vm348_vm0, %v1102_v11  ;;  %v549_v15 = vadd.f32 %v548_v10, %v547_v49 }
  0x37   : > { %778 = vmatpush.xpose.msk.msra.mxu0 %vm348_vm0, %v321_v12  ;;  %v529_v12 = vmul.f32 %v1102_v11, %v1102_v11 }
  0x38   : > { %795 = vmatpush.xpose.msk.msra.mxu1 %vm348_vm0, %v1109_v13 }
  0x3b   : > { %779 = vmatpush.xpose.msk.msra.mxu0 %vm348_vm0, %v320_v16  ;;  %v530_v16 = vmul.f32 %v1095_v9, %v1095_v9  ;;  %v533_v9 = vmul.f32 %v1074_v3, %v1074_v3 }
  0x3c   : > { %796 = vmatpush.xpose.msk.msra.mxu1 %vm348_vm0, %v1117_v17  ;;  %v531_v17 = vmul.f32 %v1088_v7, %v1088_v7 }
  0x3d   : > { %v556_v11 = vsel %vm348_vm0, %v530_v16, 0.0 }
  0x3e   : > { %v558_v23 = vsel %vm348_vm0, %v531_v17, 0.0 }
  0x3f   : > { %780 = vmatpush.xpose.msk.msra.mxu0 %vm348_vm0, %v319_v25 }
  0x40   : > { %797 = vmatpush.xpose.msk.msra.mxu1 %vm348_vm0, %v1128_v26  ;;  %v534_v26 = vmul.f32 %v1067_v1, %v1067_v1 }
  0x42   : > { %v564_v29 = vsel %vm348_vm0, %v534_v26, 0.0 }
  0x43   : > { %781 = vmatpush.xpose.msk.msra.mxu0 %vm348_vm0, %v318_v36 }
  0x44   : > { %798 = vmatpush.xpose.msk.msra.mxu1 %vm348_vm0, %v334_v37 }
  0x47   : > { %782 = vmatpush.xpose.msk.msra.mxu0 %vm348_vm0, %v317_v44 }
  0x48   : > { %799 = vmatpush.xpose.msk.msra.mxu1 %vm348_vm0, %v333_v31 }
  0x4b   : > { %783 = vmatpush.xpose.msk.msra.mxu0 %vm348_vm0, %v316_v48 }
  0x4c   : > { %800 = vmatpush.xpose.msk.msra.mxu1 %vm348_vm0, %v332_v27 }
  0x4f   : > { %784 = vmatpush.xpose.msk.msra.mxu0 %vm348_vm0, %v315_v50 }
  0x50   : > { %801 = vmatpush.xpose.msk.msra.mxu1 %vm348_vm0, %v331_v20  ;;  %v554_v20 = vsel %vm348_vm0, %v529_v12, 0.0 }
  0x53   : > { %785 = vmatpush.xpose.msk.msra.mxu0 %vm348_vm0, %v314_v51 }
  0x54   : > { %802 = vmatpush.xpose.msk.msra.mxu1 %vm348_vm0, %v330_v18  ;;  %v552_v18 = vsel %vm348_vm0, %v528_v8, 0.0 }
  0x57   : > { %786 = vmatpush.xpose.msk.msra.mxu0 %vm348_vm0, %v313_v52 }
  0x58   : > { %803 = vmatpush.xpose.msk.msra.mxu1 %vm348_vm0, %v329_v14  ;;  %v550_v14 = vsel %vm348_vm0, %v527_v6, 0.0 }
  0x59   : > { %v551_v19 = vadd.f32 %v550_v14, %v549_v15 }
  0x5b   : > { %787 = vmatpush.xpose.msk.msra.mxu0 %vm348_vm0, %v312_v53  ;;  %v553_v13 = vadd.f32 %v552_v18, %v551_v19 }
  0x5c   : > { %804 = vmatpush.xpose.msk.msra.mxu1 %vm348_vm0, %v328_v21  ;;  %v532_v21 = vmul.f32 %v1081_v5, %v1081_v5  ;;  %v562_v5 = vsel %vm348_vm0, %v533_v9, 0.0 }
  0x5d   : > { %v555_v22 = vadd.f32 %v554_v20, %v553_v13 }
  0x5e   : > { %788 = vmatmul.msk.f32.vlgmr.msra.gmra.mxu0 %vm348_vm0, %v344_v54  ;;  %v560_v7 = vsel %vm348_vm0, %v532_v21, 0.0 }
  0x5f   : > { %805 = vmatmul.msk.f32.vlgmr.msra.gmra.mxu1 %vm348_vm0, %v345_v55  ;;  %v557_v24 = vadd.f32 %v556_v11, %v555_v22 }
  0x61   : > { %v559_v25 = vadd.f32 %v558_v23, %v557_v24 }
  0x63   : > { %v561_v27 = vadd.f32 %v560_v7, %v559_v25 }
  0x65   : > { %v563_v28 = vadd.f32 %v562_v5, %v561_v27 }
  0x67   : > { %v565_v30 = vadd.f32 %v564_v29, %v563_v28 }
  0x69   : > { %566 = vadd.xlane.f32.xlu0 %v565_v30 }
  0x77   : > { %v619_v61 = vpop.permute.xlu2 %618 }
  0xdb   : > { %v417_v57 = vpop.f32.mrf.mxu0 }
  0xdc   : > { %v488_v58 = vpop.f32.mrf.mxu1  ;;  %v575_v59 = vmul.f32 %v417_v57, %v417_v57  ;;  %806 = vmatpush.msk.msra.mxu2 %vm495_vm1, %v417_v57 }
  0xdd   : > { %v587_v60 = vmul.f32 %v488_v58, %v417_v57  ;;  %807 = vmatmul.msk.f32.vlgmr.msra.gmra.mxu2 %vm491_vm2, %v346_v56 }
  0xde   : > { %v615_v62 = vmul.f32 2.0, %v575_v59  ;;  %v601_v2 = vsel %vm495_vm1, %v575_v59, 0.0 }
  0xdf   : > { %v588_v63 = vsel %vm495_vm1, %v587_v60, 0.0 }
  0xe0   : > { %589 = vadd.xlane.f32.xlu1 %v588_v63  ;;  %v621_v0 = vadd.f32 %v619_v61, %v615_v62 }
  0xe2   : > { %622 = vst [vmem:[%s1185_s17] sm:$0x1f] %v621_v0 }
  0xe8   : > { %602 = vadd.xlane.f32.xlu1 %v601_v2 }
 0x160   : > { %v516_v31 = vpop.f32.mrf.mxu2 }
 0x161   : > { %v576_v32 = vmul.f32 %v516_v31, %v417_v57 }
 0x163   : > { %v577_v3 = vsel %vm495_vm1, %v576_v32, 0.0 }
 0x164   : > { %578 = vadd.xlane.f32.xlu0 %v577_v3 }
 0x165   : > { %896 = shalt.err (!%p893_p3)
}
 0x166   : > { %823 = dma.vmem_to_hbm [thread:$0]  (%p1044_p5), %s656_s22, 128, %s658_s23, %s629_s29   ;;  %v567_v1 = vpop.xlane.xlu0 %566  ;;  %v590_v39 = vpop.xlane.xlu1 %589 }
 0x167   : > { %v568_v33 = vrot.slane %v567_v1, 4  ;;  %v591_v41 = vrot.slane %v590_v39, 4  ;;  %s639_s21 = scalar_lea.hbm %s1276_s6, %s810_s18  ;;  %s1291_s29 = sshll.u32 %s1175_s13, 3 }
 0x168   : > { %s292_s8 = scalar_lea.vmem [#allocation2], %s1291_s29  ;;  %s643_s14 = sshll.u32 %s639_s21, 4  ;;  %s644_s14 = int_to_ptr.hbm [resolvable:$true] %s643_s14 }
 0x169   : > { %v569_v34 = vadd.f32 %v568_v33, %v567_v1  ;;  %v592_v43 = vadd.f32 %v591_v41, %v590_v39  ;;  %s641_s9 = sshll.u32 %s292_s8, 4  ;;  %s911_s28 = sshra.s32 %s644_s14, 4  ;;  %s642_s9 = int_to_ptr.vmem [resolvable:$true] %s641_s9  ;;  %s912_s28 = int_to_ptr.hbm [resolvable:$true] %s911_s28 }
 0x16a   : > { %s913_s4 = scalar_lea.hbm %s912_s28, 8  ;;  %p918_p9 = scmp.lt.s32.totalorder %s912_s28, %s1276_s6 }
 0x16b   : > { %v570_v35 = vrot.slane %v569_v34, 2  ;;  %v593_v45 = vrot.slane %v592_v43, 2  ;;  %p914_p4 = scmp.ne.s32.totalorder %s912_s28, %s913_s4 }
 0x16d   : > { %v571_v36 = vadd.f32 %v570_v35, %v569_v34  ;;  %v594_v50 = vadd.f32 %v593_v45, %v592_v43  ;;  %p915_p7 = pnand %p914_p4, %p1044_p5 }
 0x16e   : > { %v603_v40 = vpop.xlane.xlu1 %602 }
 0x16f   : > { %v572_v37 = vrot.slane %v571_v36, 1  ;;  %v604_v42 = vrot.slane %v603_v40, 4  ;;  %v595_v54 = vrot.slane %v594_v50, 1  ;;  %p916_p8 = pneg %p915_p7 }
 0x171   : > { %v573_v38 = vadd.f32 %v572_v37, %v571_v36  ;;  %v605_v44 = vadd.f32 %v604_v42, %v603_v40  ;;  %v596_v58 = vadd.f32 %v595_v54, %v594_v50 }
 0x173   : > { %814 = vpush %v573_v38  ;;  %v606_v47 = vrot.slane %v605_v44, 2 }
 0x175   : > { %v607_v51 = vadd.f32 %v606_v47, %v605_v44 }
 0x177   : > { %v608_v56 = vrot.slane %v607_v51, 1 }
 0x179   : > { %v609_v59 = vadd.f32 %v608_v56, %v607_v51 }
 0x1a4   : > { %s815_s0 = spop %814 }
 0x1d7   : > { %v579_v46 = vpop.xlane.xlu0 %578 }
 0x1d8   : > { %v580_v48 = vrot.slane %v579_v46, 4 }
 0x1da   : > { %v581_v49 = vadd.f32 %v580_v48, %v579_v46 }
 0x1dc   : > { %v582_v52 = vrot.slane %v581_v49, 2 }
 0x1de   : > { %v583_v53 = vadd.f32 %v582_v52, %v581_v49 }
 0x1e0   : > { %v584_v55 = vrot.slane %v583_v53, 1 }
 0x1e2   : > { %v585_v57 = vadd.f32 %v584_v55, %v583_v53 }
 0x1e4   : > { %816 = vpush %v585_v57 }
 0x1e5   : > { %818 = vpush %v596_v58 }
 0x1e6   : > { %820 = vpush %v609_v59 }
 0x215   : > { %s817_s1 = spop %816 }
 0x216   : > { %s819_s16 = spop %818 }
 0x217   : > { %s598_s17 = smul.f32 2.0, %s819_s16  ;;  %s821_s22 = spop %820 }
 0x218   : > { %s611_s2 = smul.f32 2.0, %s821_s22  ;;  %s624_s16 = scalar_lea.sflag [#allocation3], %s1175_s13 }
 0x219   : > { %s599_s23 = ssub.f32 %s817_s1, %s598_s17  ;;  %s917_s17 = scalar_lea.hbm %s1276_s6, 16 }
 0x21a   : > { %p919_p10 = scmp.lt.s32.totalorder %s917_s17, %s913_s4 }
 0x21b   : > { %s600_s15 = sadd.f32 %s815_s0, %s599_s23 }
 0x21c   : > { %p920_p11 = por %p919_p10, %p918_p9 }
 0x21d   : > { %s612_s3 = sadd.f32 %s611_s2, %s600_s15 }
 0x21e   : > { %p921_p12 = pnand %p920_p11, %p916_p8 }
 0x21f   : > { %v613_v60 = vstv %s612_s3 }
 0x220   : > { %614 = vst [vmem:[%s292_s8] sm:$0xff] %v613_v60 }
 0x221   : > { %924 = shalt.err (!%p921_p12)
}
 0x222   : > { %822 = dma.vmem_to_hbm [thread:$0]  (%p1044_p5), %s642_s9, 128, %s644_s14, %s624_s16  }
 0x223 PF: > { %p833_p13 = scmp.ge.s32.totalorder %s963_s27, 2  ;;  %s669_s2 = sand.u32 1, %s951_s24  }
 0x224   : > { %s670_s3 = scalar_lea.sflag [#allocation3], %s669_s2 }
 0x225   : > { %p827_p0 = pnand %p833_p13, %p1048_p6 }
 0x227   : > { %p828_p1 = pneg %p827_p0 }
 0x229   : > { %942 = dma.done.wait (%p828_p1), %s670_s3, 128  }
 0x22a   : > { %944 = vsyncadd (%p828_p1), %s670_s3, 4294967168  ;;  %s680_s13 = scalar_lea.sflag [#allocation5], %s669_s2 }
 0x22b   : > { %946 = dma.done.wait (%p828_p1), %s680_s13, 128  }
 0x22c   : > { %948 = vsyncadd (%p828_p1), %s680_s13, 4294967168  ;;  %p21_p5 = scmp.ge.s32.totalorder %s1031_s30, 4   ;;  %s1292_s24 = smov %s955_s25 }
 0x22d   : > { %s1293_s25 = smov %s959_s26  ;;  %s1294_s26 = smov %s1042_s10 }
 0x22e   : > { %s1295_s27 = smov %s1031_s30  ;;  %23 = sbr.rel (!%p21_p5) target bundleno = 11 (0xb), region = 99 }
 0x233   :  { %686 = vsyncpa [#allocation3], 1 }
 0x234   :  { %688 = vsyncpa [#allocation3 + $0x1], 1 }
 0x235   :  { %689 = vsyncpa [#allocation5], 1 }
 0x236   :  { %691 = vsyncpa [#allocation5 + $0x1], 1 }

</bundles_post_ra>
